<compile_context>
chip_gen: v5e
topology: v5e:2x2
jax: 0.10.0
libtpu: 0.0.40
codegen_flags: <defaults>
</compile_context>

<pallas_src>
import functools

import jax
import jax.numpy as jnp
from jax.experimental import pallas as pl
from jax.experimental.pallas import tpu as pltpu


def _contrastive_kernel(x1_ref, x2_ref, label_ref, out_ref, *,
                        margin, eps, batch, tile_b, ragged):
    x1 = x1_ref[...].astype(jnp.float32)              # (TILE_B, D)
    x2 = x2_ref[...].astype(jnp.float32)              # (TILE_B, D)
    lbl = label_ref[...].astype(jnp.float32)          # (TILE_B, 1)

    diff = x1 - x2 + eps                               # matches F.pairwise_distance eps
    sq_sum = jnp.sum(diff * diff, axis=-1, keepdims=True)   # (TILE_B, 1) = d^2
    d = jnp.sqrt(sq_sum)                               # only needed for the hinge term

    hinge = jnp.maximum(margin - d, 0.0)
    per_row = (1.0 - lbl) * sq_sum + lbl * (hinge * hinge)   # (TILE_B, 1)

    if ragged:
        # Only compiled when B % tile_b != 0: mask padded rows of the ragged
        # last tile so garbage/NaN from the out-of-bounds DMA cannot leak.
        step = pl.program_id(0)
        row_idx = step * tile_b + jax.lax.broadcasted_iota(
            jnp.int32, per_row.shape, 0)
        per_row = jnp.where(row_idx < batch, per_row, 0.0)

    # Per-tile partial sum -> element [0, 0] of this tile's (8, 128) output
    # block (the rest is zero), so the wrapper-side jnp.sum is exact.
    partial = jnp.sum(per_row)
    ii = jax.lax.broadcasted_iota(jnp.int32, (8, 128), 0)
    jj = jax.lax.broadcasted_iota(jnp.int32, (8, 128), 1)
    out_ref[0] = jnp.where((ii == 0) & (jj == 0), partial, 0.0)


def _vmem_capacity_bytes():
    try:
        return int(pltpu.get_tpu_info().vmem_capacity_bytes)
    except Exception:
        return 128 * 1024 * 1024


def _pick_tile_b(batch, feat, itemsize, vmem_cap):
    """Largest dtype-aligned batch tile fitting a generation-aware VMEM budget."""
    # Total budget for the double-buffered pipeline buffers (headroom left for
    # compiler scratch): ~28 MiB on 128-MiB chips (v5e/v6e), ~18 MiB on
    # 64-MiB-per-TC chips (v7x).
    if vmem_cap <= 80 * 1024 * 1024:
        budget = 18 * 1024 * 1024
    else:
        budget = 28 * 1024 * 1024

    rows_align = max(8, 32 // max(itemsize, 1))   # 8 f32, 16 bf16, 32 int8/fp8
    feat_pad = max(pl.cdiv(feat, 128) * 128, 128)  # lane padding of input blocks

    # Bytes per batch row across both pipeline buffers:
    #   2 input blocks (lane-padded D) + label block padded to 128 lanes of f32.
    per_row = 2 * (2 * feat_pad * itemsize + 128 * 4)
    tile = budget // max(per_row, 1)
    if tile >= batch:
        return batch                     # block == full dim is always legal
    tile = max((tile // rows_align) * rows_align, rows_align)
    return min(tile, batch)


def contrastive_loss(output1, output2, label, margin=2.0, eps=1e-6, tile_b=None):
    """output1, output2: (B, D); label: (B,) or (B, 1). Returns scalar f32."""
    B, D = output1.shape
    label2d = jnp.reshape(label, (B, 1)).astype(jnp.float32)

    itemsize = jnp.dtype(output1.dtype).itemsize
    vmem_cap = _vmem_capacity_bytes()
    if tile_b is None:
        tile_b = _pick_tile_b(B, D, itemsize, vmem_cap)
    num_tiles = pl.cdiv(B, tile_b)
    ragged = (B % tile_b) != 0

    # VMEM accounting with lane padding:
    #   per pipeline buffer = 2 input blocks (tile_b x padded-D) +
    #   label block (tile_b rows x 128 lanes x 4 B) + output block (8x128x4 B);
    #   x2 for double buffering, plus slack for compiler scratch.
    feat_pad = max(pl.cdiv(D, 128) * 128, 128)
    per_buf = 2 * tile_b * feat_pad * itemsize + tile_b * 128 * 4 + 8 * 128 * 4
    needed = 2 * per_buf + (1 << 20)
    vmem_limit = int(min(max(needed, 16 * 1024 * 1024), vmem_cap))

    kernel = functools.partial(
        _contrastive_kernel, margin=float(margin), eps=float(eps),
        batch=B, tile_b=tile_b, ragged=ragged)

    partials = pl.pallas_call(
        kernel,
        out_shape=jax.ShapeDtypeStruct((num_tiles, 8, 128), jnp.float32),
        grid=(num_tiles,),
        in_specs=[
            pl.BlockSpec((tile_b, D), lambda i: (i, 0)),
            pl.BlockSpec((tile_b, D), lambda i: (i, 0)),
            pl.BlockSpec((tile_b, 1), lambda i: (i, 0)),
        ],
        out_specs=pl.BlockSpec((1, 8, 128), lambda i: (i, 0, 0)),
        compiler_params=pltpu.CompilerParams(
            # Independent per-tile partial sums: lets v7x split the batch
            # tiles across both TensorCores; harmless on v5e/v6e.
            dimension_semantics=("parallel",),
            vmem_limit_bytes=vmem_limit,
        ),
    )(output1, output2, label2d)

    # Final reduction over the tiny (num_tiles, 8, 128) partials + mean / 2.
    return jnp.sum(partials) * (0.5 / B)


def _reference(output1, output2, label, margin=2.0, eps=1e-6):
    d = jnp.linalg.norm(output1.astype(jnp.float32) - output2.astype(jnp.float32) + eps,
                        axis=-1)
    lbl = label.astype(jnp.float32)
    return jnp.mean((1.0 - lbl) * d ** 2 + lbl * jnp.maximum(margin - d, 0.0) ** 2) / 2.0


if __name__ == "__main__":
    key = jax.random.PRNGKey(0)
    k1, k2, k3 = jax.random.split(key, 3)

    # Small shapes consistent with the module: (B, D) embeddings + (B,) labels.
    B, D = 8, 32
    output1 = jax.random.normal(k1, (B, D), dtype=jnp.float32)
    output2 = jax.random.normal(k2, (B, D), dtype=jnp.float32)
    label = jax.random.bernoulli(k3, 0.5, (B,)).astype(jnp.float32)

    loss = jax.block_until_ready(contrastive_loss(output1, output2, label, margin=2.0))
    ref = _reference(output1, output2, label, margin=2.0)
    assert jnp.allclose(loss, ref, rtol=1e-5, atol=1e-5), (loss, ref)

    # Ragged multi-tile check (B not a multiple of the tile): exercises the
    # parallel grid, per-tile partial outputs and the last-tile row mask.
    B2 = 13
    o1 = jax.random.normal(k1, (B2, D), dtype=jnp.float32)
    o2 = jax.random.normal(k2, (B2, D), dtype=jnp.float32)
    lb = jax.random.bernoulli(k3, 0.5, (B2,)).astype(jnp.float32)
    loss2 = jax.block_until_ready(contrastive_loss(o1, o2, lb, margin=2.0, tile_b=8))
    ref2 = _reference(o1, o2, lb, margin=2.0)
    assert jnp.allclose(loss2, ref2, rtol=1e-5, atol=1e-5), (loss2, ref2)

    print("KERNEL_OK")
</pallas_src>

<mosaic_0001>
module attributes {stable_mosaic.version = 11 : i64} {
  func.func @_contrastive_kernel(%arg0: i32, %arg1: memref<8x32xf32, #tpu.memory_space<vmem>>, %arg2: memref<8x32xf32, #tpu.memory_space<vmem>>, %arg3: memref<8x1xf32, #tpu.memory_space<vmem>>, %arg4: memref<1x8x128xf32, #tpu.memory_space<vmem>>) attributes {dimension_semantics = [#tpu.dimension_semantics<parallel>], iteration_bounds = array<i64: 1>, scalar_prefetch = 0 : i64, scratch_operands = 0 : i64, tpu.core_type = #tpu.core_type<tc>, window_params = [{transform_indices = @transform_0, window_bounds = array<i64: 8, 32>}, {transform_indices = @transform_1, window_bounds = array<i64: 8, 32>}, {transform_indices = @transform_2, window_bounds = array<i64: 8, 1>}, {transform_indices = @transform_3, window_bounds = array<i64: 1, 8, 128>}]} {
    %c0 = arith.constant 0 : index
    %c0_0 = arith.constant 0 : index
    %0 = vector.load %arg1[%c0, %c0_0] : memref<8x32xf32, #tpu.memory_space<vmem>>, vector<8x32xf32>
    %c0_1 = arith.constant 0 : index
    %c0_2 = arith.constant 0 : index
    %1 = vector.load %arg2[%c0_1, %c0_2] : memref<8x32xf32, #tpu.memory_space<vmem>>, vector<8x32xf32>
    %c0_3 = arith.constant 0 : index
    %c0_4 = arith.constant 0 : index
    %2 = vector.load %arg3[%c0_3, %c0_4] : memref<8x1xf32, #tpu.memory_space<vmem>>, vector<8x1xf32>
    %3 = arith.subf %0, %1 : vector<8x32xf32>
    %cst = arith.constant 9.99999997E-7 : f32
    %4 = vector.broadcast %cst : f32 to vector<8x32xf32>
    %5 = arith.addf %3, %4 : vector<8x32xf32>
    %6 = arith.mulf %5, %5 : vector<8x32xf32>
    %cst_5 = arith.constant dense<0.000000e+00> : vector<8xf32>
    %7 = vector.multi_reduction <add>, %6, %cst_5 [1] : vector<8x32xf32> to vector<8xf32>
    %8 = vector.shape_cast %7 : vector<8xf32> to vector<8x1xf32>
    %9 = math.sqrt %8 : vector<8x1xf32>
    %cst_6 = arith.constant 2.000000e+00 : f32
    %10 = vector.broadcast %cst_6 : f32 to vector<8x1xf32>
    %11 = arith.subf %10, %9 : vector<8x1xf32>
    %cst_7 = arith.constant 0.000000e+00 : f32
    %12 = vector.broadcast %cst_7 : f32 to vector<8x1xf32>
    %13 = arith.maximumf %11, %12 : vector<8x1xf32>
    %cst_8 = arith.constant 1.000000e+00 : f32
    %14 = vector.broadcast %cst_8 : f32 to vector<8x1xf32>
    %15 = arith.subf %14, %2 : vector<8x1xf32>
    %16 = arith.mulf %15, %8 : vector<8x1xf32>
    %17 = arith.mulf %13, %13 : vector<8x1xf32>
    %18 = arith.mulf %2, %17 : vector<8x1xf32>
    %19 = arith.addf %16, %18 : vector<8x1xf32>
    %20 = vector.shape_cast %19 : vector<8x1xf32> to vector<1x8x1xf32>
    %cst_9 = arith.constant dense<0.000000e+00> : vector<1xf32>
    %21 = vector.multi_reduction <add>, %20, %cst_9 [1, 2] : vector<1x8x1xf32> to vector<1xf32>
    %22 = vector.shape_cast %21 : vector<1xf32> to vector<1x1x1xf32>
    %23 = vector.extract %22[0, 0, 0] : f32 from vector<1x1x1xf32>
    %24 = tpu.iota {dimensions = array<i32: 0>} : vector<8x128xi32>
    %25 = tpu.iota {dimensions = array<i32: 1>} : vector<8x128xi32>
    %c0_i32 = arith.constant 0 : i32
    %26 = vector.broadcast %c0_i32 : i32 to vector<8x128xi32>
    %27 = arith.cmpi eq, %24, %26 : vector<8x128xi32>
    %c0_i32_10 = arith.constant 0 : i32
    %28 = vector.broadcast %c0_i32_10 : i32 to vector<8x128xi32>
    %29 = arith.cmpi eq, %25, %28 : vector<8x128xi32>
    %30 = arith.andi %27, %29 : vector<8x128xi1>
    %cst_11 = arith.constant 0.000000e+00 : f32
    %31 = vector.broadcast %23 : f32 to vector<8x128xf32>
    %32 = vector.broadcast %cst_11 : f32 to vector<8x128xf32>
    %33 = arith.select %30, %31, %32 : vector<8x128xi1>, vector<8x128xf32>
    %c0_12 = arith.constant 0 : index
    %c0_13 = arith.constant 0 : index
    %c0_14 = arith.constant 0 : index
    %34 = vector.load %arg4[%c0_12, %c0_13, %c0_14] : memref<1x8x128xf32, #tpu.memory_space<vmem>>, vector<1x8x128xf32>
    %35 = vector.shape_cast %34 : vector<1x8x128xf32> to vector<8x128xf32>
    %36 = vector.shape_cast %33 : vector<8x128xf32> to vector<1x8x128xf32>
    tpu.vector_store %arg4[%c0_12, %c0_13, %c0_14], %36 {strides = array<i32>} : memref<1x8x128xf32, #tpu.memory_space<vmem>>, vector<1x8x128xf32>,
    return
  }
  func.func @transform_0(%arg0: i32) -> (i32, i32) {
    %c0_i32 = arith.constant 0 : i32
    %c0_i32_0 = arith.constant 0 : i32
    return %arg0, %c0_i32 : i32, i32
  }
  func.func @transform_1(%arg0: i32) -> (i32, i32) {
    %c0_i32 = arith.constant 0 : i32
    %c0_i32_0 = arith.constant 0 : i32
    return %arg0, %c0_i32 : i32, i32
  }
  func.func @transform_2(%arg0: i32) -> (i32, i32) {
    %c0_i32 = arith.constant 0 : i32
    %c0_i32_0 = arith.constant 0 : i32
    return %arg0, %c0_i32 : i32, i32
  }
  func.func @transform_3(%arg0: i32) -> (i32, i32, i32) {
    %c0_i32 = arith.constant 0 : i32
    %c0_i32_0 = arith.constant 0 : i32
    %c0_i32_1 = arith.constant 0 : i32
    return %arg0, %c0_i32, %c0_i32_0 : i32, i32, i32
  }
}

</mosaic_0001>

<bundles_post_ra>
// kernel: tpu_custom_call.1
= control target key start
LH: loop header
LB: loop body
LE: loop exit
PB: predicated region body
PF: predicated region fallthrough
CT: control target
= control target key end

     0   :  { %8 = vsyncpa [#allocation3], 0  ;;  %s188_s0 = inlined_call_operand.vmem [shape: f32[8,32], index: 0, kind: input, shape index: {}]   ;;  %s189_s1 = inlined_call_operand.hbm [shape: f32[8,32], index: 1, kind: input, shape index: {}]   ;;  %s190_s2 = inlined_call_operand.vmem [shape: f32[8,1], index: 2, kind: input, shape index: {}]   ;;  %s191_s3 = inlined_call_operand.hbm [shape: f32[1,8,128], index: 3, kind: output, shape index: {}]  }
   0x1   :  { %9 = vsyncpa [#allocation4], 0  ;;  %s17_s14 = sshll.u32 %s189_s1, 4  ;;  %s154_s15 = smov [#allocation2]   ;;  %s18_s14 = int_to_ptr.hbm [resolvable:$true] %s17_s14 }
   0x2   :  { %s19_s16 = sshll.u32 %s154_s15, 4  ;;  %s20_s16 = int_to_ptr.vmem [resolvable:$true] %s19_s16 }
   0x3   :  { %22 = dma.hbm_to_vmem [thread:$0]  %s18_s14, 128, %s20_s16, [#allocation3]  }
   0x4   :  { %150 = dma.done.wait [#allocation3], 128  }
   0x5   :  { %151 = vsyncadd [#allocation3], 4294967168  ;;  %v29_v0 = vld [vmem:[%s188_s0] sm:$0xff]  ;;  %vm35_vm0 = vcmask 261120   ;;  %vm58_vm3 = vcmask 7168   ;;  %v69_v33 = vlaneseq  ;;  %s86_s22 = sshll.u32 %s191_s3, 4  ;;  %s87_s22 = int_to_ptr.hbm [resolvable:$true] %s86_s22 }
   0x6   :  { %v30_v1 = vld [vmem:[#allocation2] sm:$0xff] }
   0x7   :  { %v32_v2 = vsub.f32 %v29_v0, %v30_v1  ;;  %v31_v16 = vld [vmem:[%s190_s2] sm:$0xff]  ;;  %v70_v34 = vshrl.u32 %v69_v33, 7  ;;  %v72_v35 = vand.u32 127, %v69_v33  ;;  %s155_s2 = smov [#allocation5]  }
   0x8   :  { %v53_v20 = vsub.f32 1.0, %v31_v16  ;;  %s84_s19 = sshll.u32 %s155_s2, 4  ;;  %s85_s19 = int_to_ptr.vmem [resolvable:$true] %s84_s19 }
   0x9   :  { %v33_v3 = vadd.f32 1e-06, %v32_v2  ;;  %vm73_vm4 = vcmp.eq.s32.totalorder %v70_v34, 0  ;;  %vm74_vm5 = vcmp.eq.s32.totalorder %v72_v35, 0 }
   0xa   :  { %vm75_vm6 = vmand %vm73_vm4, %vm74_vm5 }
   0xb   :  { %v34_v4 = vmul.f32 %v33_v3, %v33_v3 }
   0xd   :  { %v36_v5 = vsel %vm35_vm0, %v34_v4, 0.0 }
   0xe   :  { %37 = vadd.xlane.f32.xlu0 %v36_v5 }
  0x81   :  { %v38_v6 = vpop.xlane.xlu0 %37 }
  0x82   :  { %100 = vrsqrt.f32 %v38_v6  ;;  %vm46_vm1 = vcmp.eq.f32.partialorder %v38_v6, inf  ;;  %v49_v14 = vand.u32 2147483648, %v38_v6  ;;  %vm48_vm2 = vcmp.eq.f32.partialorder %v38_v6, 0.0 }
  0x83   :  { %v54_v22 = vmul.f32 %v53_v20, %v38_v6 }
  0x88   :  { %v101_v7 = vpop.eup %100 }
  0x89   :  { %v40_v8 = vmul.f32 %v101_v7, %v38_v6 }
  0x8b   :  { %v41_v9 = vmul.f32 %v101_v7, %v40_v8 }
  0x8d   :  { %v42_v10 = vmul.f32 0.5, %v41_v9 }
  0x8f   :  { %v43_v11 = vsub.f32 1.5, %v42_v10 }
  0x91   :  { %v44_v12 = vmul.f32 %v101_v7, %v43_v11 }
  0x93   :  { %v45_v13 = vmul.f32 %v44_v12, %v38_v6 }
  0x95   :  { %v47_v15 = vsel %vm46_vm1, %v38_v6, %v45_v13 }
  0x96   :  { %v50_v17 = vsel %vm48_vm2, %v49_v14, %v47_v15 }
  0x97   :  { %v51_v18 = vsub.f32 2.0, %v50_v17 }
  0x99   :  { %v52_v19 = vmax.f32 %v51_v18, 0.0 }
  0x9b   :  { %v55_v21 = vmul.f32 %v52_v19, %v52_v19 }
  0x9d   :  { %v56_v23 = vmul.f32 %v55_v21, %v31_v16 }
  0x9f   :  { %v57_v24 = vadd.f32 %v56_v23, %v54_v22 }
  0xa1   :  { %v59_v25 = vsel %vm58_vm3, %v57_v24, 0.0 }
  0xa2   :  { %60 = vadd.xlane.f32.xlu0 %v59_v25 }
 0x115   :  { %v61_v26 = vpop.xlane.xlu0 %60 }
 0x116   :  { %v62_v27 = vrot.slane %v61_v26, 4 }
 0x118   :  { %v63_v28 = vadd.f32 %v62_v27, %v61_v26 }
 0x11a   :  { %v64_v29 = vrot.slane %v63_v28, 2 }
 0x11c   :  { %v65_v30 = vadd.f32 %v64_v29, %v63_v28 }
 0x11e   :  { %v66_v31 = vrot.slane %v65_v30, 1 }
 0x120   :  { %v67_v32 = vadd.f32 %v66_v31, %v65_v30 }
 0x122   :  { %96 = vpush %v67_v32 }
 0x153   :  { %s97_s23 = spop %96 }
 0x154   :  { %v76_v36 = vstv %s97_s23 }
 0x155   :  { %v77_v37 = vsel %vm75_vm6, %v76_v36, 0.0 }
 0x156   :  { %78 = vst [vmem:[#allocation5] sm:$0xff] %v77_v37 }
 0x157   :  { %89 = dma.vmem_to_hbm [thread:$0]  %s85_s19, 128, %s87_s22, [#allocation4]  }
 0x158   :  { %152 = dma.done.wait [#allocation4], 128  }
 0x159   :  { %153 = vsyncadd [#allocation4], 4294967168 }
 0x15a   :  { %94 = vsyncpa [#allocation3], 1 }
 0x15b   :  { %95 = vsyncpa [#allocation4], 1 }

</bundles_post_ra>
